<compile_context>
chip_gen: v6e
topology: v6e:2x2x1
jax: 0.10.0
libtpu: 0.0.40
codegen_flags: <defaults>
</compile_context>

<pallas_src>
import math

import jax
import jax.numpy as jnp
from jax import lax
from jax.experimental import pallas as pl
from jax.experimental.pallas import tpu as pltpu

EPS = 1e-5
MOMENTE = 0.9


# ---------------------------------------------------------------------------
# Generation-aware VMEM budgeting
# ---------------------------------------------------------------------------
def _tpu_budget():
    """(per-tile byte target, scoped vmem limit) for this TPU generation.

    v5e/v6e: 128 MiB VMEM/TC -> ~9.6 MiB tiles under a 96 MiB scoped limit.
    v7x    :  64 MiB VMEM/TC -> ~4.8 MiB tiles under a 48 MiB scoped limit.
    If the query fails we fall back to the conservative (v7x-sized) budget so
    we never overshoot physical VMEM."""
    try:
        vmem = int(pltpu.get_tpu_info().vmem_capacity_bytes)
    except Exception:
        vmem = 64 * 1024 * 1024
    limit = min(96 * 1024 * 1024, (vmem * 3) // 4)
    target = max(1 * 1024 * 1024, limit // 10)
    return target, limit


def _round_down(v, m):
    return max(m, (v // m) * m)


def _prefer_divisor(tile, total, m):
    """Largest multiple of m <= tile that divides total evenly (if any)."""
    for cand in range(tile, m - 1, -m):
        if total % cand == 0:
            return cand
    return tile


def _plan_tiles(n_rows, n_cols, itemsize, target_bytes, limit_bytes):
    """Tile the (n_rows, n_cols) slab for the streaming normalize pass.

    * col tile: multiple of 128 (lane-dense, unmasked vst) or full extent;
    * row tile: multiple of the dtype's sublane packing or full extent;
    * double-buffered (in + out) x/y tiles fit the per-tile byte target;
    * the (1, tc) f32 scale/shift blocks occupy 8 sublanes in VMEM
      (2 arrays x 2 buffers x 8 x 4 B = 128 B per column) -> keep that under
      ~1/4 of the scoped limit;
    * >= 4 grid steps when the tensor is large (pipeline overlap, both v7x TCs);
    * prefer tiles that divide the extent evenly (no masked tail block).
    """
    sub = {4: 8, 2: 16, 1: 32}.get(itemsize, 8)
    min_rows = min(sub, n_rows)
    max_cols = max(128, _round_down(limit_bytes // (4 * 128), 128))

    if n_cols <= max_cols and (
            n_cols < 256 or n_cols * itemsize * min_rows <= target_bytes):
        tc = n_cols
    else:
        tc = min(target_bytes // (min_rows * itemsize), max_cols)
        tc = max(128, (tc // 128) * 128)
        tc = min(tc, (n_cols // 128) * 128)
        tc = _prefer_divisor(tc, n_cols, 128)

    cap = max(1, target_bytes // (tc * itemsize))
    if cap >= n_rows:
        tn = n_rows
    else:
        tn = min(max(sub, (cap // sub) * sub), n_rows)
        if tn < n_rows:
            tn = _prefer_divisor(tn, n_rows, sub)

    # Guarantee multiple grid steps when the tensor is big enough to care.
    if n_rows * n_cols * itemsize >= (4 << 20) and tn == n_rows and tc == n_cols:
        if n_rows >= 2 * sub:
            tn = _prefer_divisor(
                min(n_rows, max(sub, ((-(-n_rows // 4)) // sub) * sub)),
                n_rows, sub)
        elif n_cols >= 2 * 128:
            tc = _prefer_divisor(
                min(n_cols, max(128, ((-(-n_cols // 4)) // 128) * 128)),
                n_cols, 128)
    return tn, tc


# ---------------------------------------------------------------------------
# Stage 0: real_max = mean over samples of max over (C, H, W), column-tiled.
# ---------------------------------------------------------------------------
def _make_real_max_kernel(total_cols, tile_cols):
    def kernel(li_ref, out_ref, rowmax_ref):
        j = pl.program_id(0)
        x = li_ref[...]                                     # (nl, tile_cols)
        # Mask the OOB tail of the last column tile (its contents are garbage).
        col = j * tile_cols + lax.broadcasted_iota(jnp.int32, x.shape, 1)
        x = jnp.where(col < total_cols, x, -jnp.inf)
        tile_max = jnp.max(x, axis=1, keepdims=True).astype(jnp.float32)

        @pl.when(j == 0)
        def _():
            rowmax_ref[...] = jnp.full(rowmax_ref.shape, -jnp.inf, jnp.float32)

        rowmax_ref[...] = jnp.maximum(rowmax_ref[...], tile_max)

        @pl.when(j == pl.num_programs(0) - 1)
        def _():
            out_ref[...] = jnp.mean(rowmax_ref[...], axis=0, keepdims=True)

    return kernel


def _compute_real_max(last_layer_input, vmem_limit):
    nl = last_layer_input.shape[0]
    m = int(math.prod(last_layer_input.shape[1:]))
    li2d = last_layer_input.reshape(nl, m)                  # free view
    itemsize = li2d.dtype.itemsize

    budget = 2 * 1024 * 1024
    if nl * m * itemsize <= budget or m <= 128:
        tc = m                                              # full-extent columns
    else:
        tc = max(128, (budget // (nl * itemsize)) // 128 * 128)  # multiple of 128

    return pl.pallas_call(
        _make_real_max_kernel(m, tc),
        out_shape=jax.ShapeDtypeStruct((1, 1), jnp.float32),
        grid=(pl.cdiv(m, tc),),
        in_specs=[pl.BlockSpec((nl, tc), lambda j: (0, j))],
        out_specs=pl.BlockSpec((1, 1), lambda j: (0, 0)),
        scratch_shapes=[pltpu.VMEM((nl, 1), jnp.float32)],
        compiler_params=pltpu.CompilerParams(
            dimension_semantics=("arbitrary",),
            vmem_limit_bytes=vmem_limit),
    )(li2d)


# ---------------------------------------------------------------------------
# Stage 1: per-channel statistics + fused scale/shift (tiny, one-shot).
# ---------------------------------------------------------------------------
def _make_stats_kernel(c_in, k, estimate_max, residual):
    mean_fac = 2.0 if residual else 1.0
    var_fac = 4.0 if residual else 1.0
    mean_coef = float(c_in) * math.sqrt(math.pi / 2.0) * mean_fac
    var_coef = float(c_in) ** 2 * (math.pi / 2.0) * var_fac
    inv_est_max = 1.0 / float(estimate_max)
    # torch.var over (1,2,3) is unbiased (divides by k-1). k==1 would be
    # NaN/inf in torch; we deliberately guard the Python-side division so
    # tracing never divides by zero (documented semantic deviation).
    inv_km1 = 1.0 / float(k - 1) if k > 1 else 1.0

    def kernel(w_ref, rmax_ref, alpha_ref, rmean_ref, rvar_ref,
               na_ref, nm_ref, nv_ref, scale_ref, shift_ref):
        w = w_ref[...].astype(jnp.float32)                   # (C, k), k on lanes
        wm = jnp.mean(w, axis=1, keepdims=True)              # (C, 1)
        wv = jnp.sum((w - wm) ** 2, axis=1, keepdims=True) * inv_km1  # unbiased

        real_max = rmax_ref[...]                             # (1, 1)
        est_mean = mean_coef * wm                            # (C, 1)
        est_var = var_coef * wv                              # (C, 1)

        alpha = real_max * inv_est_max
        new_alpha = MOMENTE * alpha_ref[...] + (1.0 - MOMENTE) * alpha

        na_ref[...] = new_alpha
        nm_ref[...] = MOMENTE * rmean_ref[...] + (1.0 - MOMENTE) * est_mean
        # Note: PyTorch uses the *fresh* batch alpha here, not new_alpha.
        nv_ref[...] = (MOMENTE * rvar_ref[...]
                       + (1.0 - MOMENTE) * (alpha * alpha) * est_var)

        # Fused scale/shift for the elementwise pass (output uses new_alpha).
        scale = lax.rsqrt(new_alpha * new_alpha * est_var + EPS)   # EUP op
        scale_ref[...] = scale
        shift_ref[...] = est_mean * scale

    return kernel


# ---------------------------------------------------------------------------
# Stage 2: lane-dense streaming normalize in the input dtype.
# ---------------------------------------------------------------------------
def _norm_kernel(x_ref, scale_ref, shift_ref, y_ref):
    # (x - mean)/sqrt(...) rewritten as x*scale - shift; upcast in-vreg so the
    # HBM traffic stays in the input dtype (works on v5e too, no bf16 VALU).
    x = x_ref[...].astype(jnp.float32)
    y_ref[...] = (x * scale_ref[...] - shift_ref[...]).astype(y_ref.dtype)


def my_static_batch_norm(x, last_layer_weight, last_layer_input,
                         running_alpha, running_mean, running_var,
                         residual=True):
    """Training-mode forward of MyStaticBatchNorm.

    Returns (y, new_running_alpha, new_running_mean, new_running_var)."""
    N, C, H, W = x.shape
    _, c_in, kh, kw = last_layer_weight.shape
    k = c_in * kh * kw
    est_max = 0.83 * math.log(math.prod(last_layer_input.shape))

    target_bytes, vmem_limit = _tpu_budget()

    # ---- Stage 0: tiled real_max reduction (no giant VMEM block) -----------
    real_max = _compute_real_max(last_layer_input, vmem_limit)

    # ---- Stage 1: tiny one-shot statistics kernel (full blocks, no grid) ---
    w2d = last_layer_weight.reshape(C, k)                    # free view
    alpha_in = running_alpha.reshape(1, 1).astype(jnp.float32)
    rmean_in = running_mean.reshape(C, 1).astype(jnp.float32)
    rvar_in = running_var.reshape(C, 1).astype(jnp.float32)

    stats_kernel = _make_stats_kernel(c_in, k, est_max, residual)
    new_alpha, new_mean, new_var, scale_c, shift_c = pl.pallas_call(
        stats_kernel,
        out_shape=(jax.ShapeDtypeStruct((1, 1), jnp.float32),   # running_alpha
                   jax.ShapeDtypeStruct((C, 1), jnp.float32),   # running_mean
                   jax.ShapeDtypeStruct((C, 1), jnp.float32),   # running_var
                   jax.ShapeDtypeStruct((C, 1), jnp.float32),   # fused scale
                   jax.ShapeDtypeStruct((C, 1), jnp.float32)),  # fused shift
        compiler_params=pltpu.CompilerParams(vmem_limit_bytes=vmem_limit),
    )(w2d, real_max, alpha_in, rmean_in, rvar_in)

    # ---- Stage 2: lane-dense (N, C*H*W) normalize ---------------------------
    hw = H * W
    chw = C * hw
    x2d = x.reshape(N, chw)                                  # free NCHW view, no cast
    # Precomputed lane-dense per-column scale/shift rows (tiny JAX glue; cost
    # equals one sample's worth of f32 traffic, independent of N).
    scale_row = jnp.broadcast_to(scale_c.reshape(1, C, 1), (1, C, hw)).reshape(1, chw)
    shift_row = jnp.broadcast_to(shift_c.reshape(1, C, 1), (1, C, hw)).reshape(1, chw)

    tn, tc = _plan_tiles(N, chw, x.dtype.itemsize, target_bytes, vmem_limit)
    # Columns are the OUTER grid axis, rows the inner one: the (1, tc)
    # scale/shift blocks keep the same block index across the whole row sweep,
    # so Pallas fetches them once per column tile (no per-step DMA).
    grid = (pl.cdiv(chw, tc), pl.cdiv(N, tn))

    y2d = pl.pallas_call(
        _norm_kernel,
        out_shape=jax.ShapeDtypeStruct((N, chw), x.dtype),
        grid=grid,
        in_specs=[pl.BlockSpec((tn, tc), lambda j, i: (i, j)),
                  pl.BlockSpec((1, tc), lambda j, i: (0, j)),
                  pl.BlockSpec((1, tc), lambda j, i: (0, j))],
        out_specs=pl.BlockSpec((tn, tc), lambda j, i: (i, j)),
        compiler_params=pltpu.CompilerParams(
            dimension_semantics=("parallel", "parallel"),
            vmem_limit_bytes=vmem_limit),
    )(x2d, scale_row, shift_row)
    # TODO(synk): add input_output_aliases={0: 0} when the caller donates x.

    y = y2d.reshape(N, C, H, W)                              # free view back to NCHW
    return (y,
            new_alpha.reshape(1),
            new_mean.reshape(1, C, 1, 1),
            new_var.reshape(1, C, 1, 1))


# ---------------------------------------------------------------------------
# Pure-JAX reference mirroring the PyTorch training branch.
# ---------------------------------------------------------------------------
def _reference_forward(x, w, li, alpha0, rmean0, rvar0, residual=True):
    c_in = li.shape[1]
    C = w.shape[0]
    wm = jnp.mean(w, axis=(1, 2, 3))
    wv = jnp.var(w, axis=(1, 2, 3), ddof=1)
    real_max = jnp.mean(jnp.max(li.reshape(li.shape[0], -1), axis=1))
    est_max = 0.83 * math.log(math.prod(li.shape))
    mf, vf = (2.0, 4.0) if residual else (1.0, 1.0)
    est_mean = (c_in * math.sqrt(math.pi / 2.0) * wm * mf).reshape(1, C, 1, 1)
    est_var = (c_in ** 2 * math.pi / 2.0 * wv * vf).reshape(1, C, 1, 1)
    alpha = real_max / est_max
    new_alpha = MOMENTE * alpha0 + (1.0 - MOMENTE) * alpha
    new_mean = MOMENTE * rmean0 + (1.0 - MOMENTE) * est_mean
    new_var = MOMENTE * rvar0 + (1.0 - MOMENTE) * alpha ** 2 * est_var
    y = (x - est_mean) / jnp.sqrt(new_alpha.reshape(1, 1, 1, 1) ** 2 * est_var + EPS)
    return y, new_alpha, new_mean, new_var


if __name__ == "__main__":
    key = jax.random.PRNGKey(0)
    k1, k2, k3 = jax.random.split(key, 3)

    num_features = 4          # C_out of the previous conv
    c_in = 4                  # C_in of the previous conv
    N, H, W = 2, 16, 16

    x = jax.random.normal(k1, (N, num_features, H, W), dtype=jnp.float32)
    last_layer_weight = jax.random.normal(k2, (num_features, c_in, 3, 3),
                                          dtype=jnp.float32)
    last_layer_input = jax.random.normal(k3, (N, c_in, H, W), dtype=jnp.float32)

    # Deterministic parameter init exactly as in __init__.
    running_mean = jnp.zeros((1, num_features, 1, 1), jnp.float32)
    running_var = jnp.ones((1, num_features, 1, 1), jnp.float32)
    running_alpha = jnp.ones((1,), jnp.float32)

    y, new_alpha, new_mean, new_var = my_static_batch_norm(
        x, last_layer_weight, last_layer_input,
        running_alpha, running_mean, running_var, residual=True)
    jax.block_until_ready((y, new_alpha, new_mean, new_var))

    y_ref, a_ref, m_ref, v_ref = _reference_forward(
        x, last_layer_weight, last_layer_input,
        running_alpha, running_mean, running_var, residual=True)

    assert jnp.allclose(y, y_ref, rtol=1e-4, atol=1e-5), "y mismatch vs reference"
    assert jnp.allclose(new_alpha, a_ref, rtol=1e-5, atol=1e-6), "alpha mismatch"
    assert jnp.allclose(new_mean, m_ref, rtol=1e-5, atol=1e-6), "running_mean mismatch"
    assert jnp.allclose(new_var, v_ref, rtol=1e-5, atol=1e-6), "running_var mismatch"

    print("KERNEL_OK")
</pallas_src>

<mosaic_0001>
module attributes {stable_mosaic.version = 11 : i64} {
  func.func @kernel(%arg0: i32, %arg1: memref<2x1024xf32, #tpu.memory_space<vmem>>, %arg2: memref<1x1xf32, #tpu.memory_space<vmem>>, %arg3: memref<2x1xf32, #tpu.memory_space<vmem>>) attributes {dimension_semantics = [#tpu.dimension_semantics<arbitrary>], iteration_bounds = array<i64: 1>, scalar_prefetch = 0 : i64, scratch_operands = 1 : i64, tpu.core_type = #tpu.core_type<tc>, window_params = [{transform_indices = @transform_0, window_bounds = array<i64: 2, 1024>}, {pipeline_mode = #tpu.pipeline_mode<synchronous>, transform_indices = @transform_1, window_bounds = array<i64: 1, 1>}]} {
    %c0 = arith.constant 0 : index
    %c0_0 = arith.constant 0 : index
    %0 = vector.load %arg1[%c0, %c0_0] : memref<2x1024xf32, #tpu.memory_space<vmem>>, vector<2x1024xf32>
    %c1024_i32 = arith.constant 1024 : i32
    %1 = arith.muli %arg0, %c1024_i32 : i32
    %2 = tpu.iota {dimensions = array<i32: 1>} : vector<2x1024xi32>
    %3 = vector.broadcast %1 : i32 to vector<2x1024xi32>
    %4 = arith.addi %3, %2 : vector<2x1024xi32>
    %c1024_i32_1 = arith.constant 1024 : i32
    %5 = vector.broadcast %c1024_i32_1 : i32 to vector<2x1024xi32>
    %6 = arith.cmpi slt, %4, %5 : vector<2x1024xi32>
    %cst = arith.constant 0xFF800000 : f32
    %7 = vector.broadcast %cst : f32 to vector<2x1024xf32>
    %8 = arith.select %6, %0, %7 : vector<2x1024xi1>, vector<2x1024xf32>
    %cst_2 = arith.constant dense<0xFF800000> : vector<2xf32>
    %9 = vector.multi_reduction <maximumf>, %8, %cst_2 [1] : vector<2x1024xf32> to vector<2xf32>
    %10 = vector.shape_cast %9 : vector<2xf32> to vector<2x1xf32>
    %c0_i32 = arith.constant 0 : i32
    %11 = arith.cmpi eq, %arg0, %c0_i32 : i32
    %12 = arith.extui %11 : i1 to i32
    %c0_i32_3 = arith.constant 0 : i32
    %13 = arith.cmpi ne, %12, %c0_i32_3 : i32
    scf.if %13 {
      %cst_10 = arith.constant 0xFF800000 : f32
      %20 = vector.broadcast %cst_10 : f32 to vector<2x1xf32>
      %c0_11 = arith.constant 0 : index
      %c0_12 = arith.constant 0 : index
      %21 = vector.load %arg3[%c0_11, %c0_12] : memref<2x1xf32, #tpu.memory_space<vmem>>, vector<2x1xf32>
      tpu.vector_store %arg3[%c0_11, %c0_12], %20 {strides = array<i32>} : memref<2x1xf32, #tpu.memory_space<vmem>>, vector<2x1xf32>,
    } else {
    }
    %c0_4 = arith.constant 0 : index
    %c0_5 = arith.constant 0 : index
    %14 = vector.load %arg3[%c0_4, %c0_5] : memref<2x1xf32, #tpu.memory_space<vmem>>, vector<2x1xf32>
    %15 = arith.maximumf %14, %10 : vector<2x1xf32>
    %c0_6 = arith.constant 0 : index
    %c0_7 = arith.constant 0 : index
    %16 = vector.load %arg3[%c0_6, %c0_7] : memref<2x1xf32, #tpu.memory_space<vmem>>, vector<2x1xf32>
    tpu.vector_store %arg3[%c0_6, %c0_7], %15 {strides = array<i32>} : memref<2x1xf32, #tpu.memory_space<vmem>>, vector<2x1xf32>,
    %c0_i32_8 = arith.constant 0 : i32
    %17 = arith.cmpi eq, %arg0, %c0_i32_8 : i32
    %18 = arith.extui %17 : i1 to i32
    %c0_i32_9 = arith.constant 0 : i32
    %19 = arith.cmpi ne, %18, %c0_i32_9 : i32
    scf.if %19 {
      %c0_10 = arith.constant 0 : index
      %c0_11 = arith.constant 0 : index
      %20 = vector.load %arg3[%c0_10, %c0_11] : memref<2x1xf32, #tpu.memory_space<vmem>>, vector<2x1xf32>
      %cst_12 = arith.constant dense<0.000000e+00> : vector<1xf32>
      %21 = vector.multi_reduction <add>, %20, %cst_12 [0] : vector<2x1xf32> to vector<1xf32>
      %22 = vector.shape_cast %21 : vector<1xf32> to vector<1x1xf32>
      %cst_13 = arith.constant 2.000000e+00 : f32
      %23 = vector.broadcast %cst_13 : f32 to vector<1x1xf32>
      %24 = arith.divf %22, %23 : vector<1x1xf32>
      %c0_14 = arith.constant 0 : index
      %c0_15 = arith.constant 0 : index
      %25 = vector.load %arg2[%c0_14, %c0_15] : memref<1x1xf32, #tpu.memory_space<vmem>>, vector<1x1xf32>
      tpu.vector_store %arg2[%c0_14, %c0_15], %24 {strides = array<i32>} : memref<1x1xf32, #tpu.memory_space<vmem>>, vector<1x1xf32>,
    } else {
    }
    return
  }
  func.func @transform_0(%arg0: i32) -> (i32, i32) {
    %c0_i32 = arith.constant 0 : i32
    %c0_i32_0 = arith.constant 0 : i32
    return %c0_i32, %arg0 : i32, i32
  }
  func.func @transform_1(%arg0: i32) -> (i32, i32) {
    %c0_i32 = arith.constant 0 : i32
    %c0_i32_0 = arith.constant 0 : i32
    %c0_i32_1 = arith.constant 0 : i32
    return %c0_i32, %c0_i32_0 : i32, i32
  }
}

</mosaic_0001>

<bundles_post_ra>
// kernel: tpu_custom_call.1
= control target key start
LH: loop header
LB: loop body
LE: loop exit
PB: predicated region body
PF: predicated region fallthrough
CT: control target
= control target key end

     0   :  { %6 = vsyncpa [#allocation4], 0  ;;  %s238_s0 = inlined_call_operand.hbm [shape: f32[2,1024], index: 0, kind: input, shape index: {}]   ;;  %s239_s1 = inlined_call_operand.hbm [shape: f32[1,1], index: 1, kind: output, shape index: {}]  }
   0x1   :  { %7 = vsyncpa [#allocation5], 0  ;;  %s210_s6 = smov [#allocation3]  }
   0x2   :  { %s14_s7 = sshll.u32 %s210_s6, 4  ;;  %s15_s7 = int_to_ptr.vmem [resolvable:$true] %s14_s7 }
   0x3   :  { %s174_s8 = scalar_lea.vmem %s15_s7, 256  ;;  %p179_p1 = scmp.lt.s32.totalorder %s15_s7, %s15_s7 }
   0x4   :  { %p175_p0 = scmp.ne.s32.totalorder %s15_s7, %s174_s8  ;;  %p180_p2 = scmp.lt.s32.totalorder %s174_s8, %s174_s8 }
   0x6   :  { %p181_p3 = por %p180_p2, %p179_p1 }
   0x8   :  { %p182_p4 = pnand %p181_p3, %p175_p0 }
   0xa   :  { %185 = shalt.err (!%p182_p4)
}
   0xb   :  { %17 = dma.hbm_to_vmem [thread:$0]  %s238_s0, 256, %s15_s7, [#allocation4]  }
   0xc   :  { %206 = dma.done.wait [#allocation4], 256  }
   0xd   :  { %207 = vsyncadd [#allocation4], 4294967040  ;;  %v56_v0 = vlaneseq  ;;  %v211_v1 = vmov 1983009808   ;;  %v21_v6 = vld [vmem:[#allocation3] sm:$0xff]  ;;  %v22_v7 = vld [vmem:[#allocation3 + $0x8] sm:$0xff] }
   0xe   :  { %v54_v2 = vunpack.c.l.s4 %v211_v1  ;;  %vm102_vm0 = vcmask 1041408   ;;  %v52_v8 = vcombine.high %v21_v6, %v21_v6  ;;  %v69_v10 = vcombine.high %v22_v7, %v22_v7  ;;  %s213_s0 = smov [#allocation6]  }
   0xf   :  { %v57_v3 = vshrl.u32 %v56_v0, 7  ;;  %vm124_vm1 = vcmask 1024   ;;  %v212_v33 = vmov -inf   ;;  %s151_s11 = sshll.u32 %s213_s0, 4  ;;  %vm143_vm2 = vcmask 0   ;;  %s152_s11 = int_to_ptr.vmem [resolvable:$true] %s151_s11 }
  0x10   :  { %v55_v4 = vunpack.c.0.s8 %v54_v2  ;;  %125 = vst.msk [vmem:[#allocation2] sm:$0x3] %vm124_vm1, %v212_v33  ;;  %s186_s12 = scalar_lea.vmem %s152_s11, 16  ;;  %s190_s13 = scalar_lea.vmem %s152_s11, 32 }
  0x11   :  { %p187_p5 = scmp.ne.s32.totalorder %s152_s11, %s186_s12  ;;  %p191_p6 = scmp.lt.s32.totalorder %s152_s11, %s152_s11 }
  0x12   :  { %v58_v5 = vsub.s32 %v55_v4, %v57_v3  ;;  %p192_p7 = scmp.lt.s32.totalorder %s190_s13, %s186_s12 }
  0x14   :  { %v59_v9 = vrot.slane %v21_v6, %v58_v5  ;;  %v76_v11 = vrot.slane %v22_v7, %v58_v5  ;;  %v66_v12 = vrot.slane %v52_v8, %v58_v5  ;;  %v83_v14 = vrot.slane %v69_v10, %v58_v5  ;;  %p193_p8 = por %p192_p7, %p191_p6 }
  0x16   :  { %v67_v13 = vcombine.high %v59_v9, %v59_v9  ;;  %v84_v15 = vcombine.high %v76_v11, %v76_v11  ;;  %v103_v16 = vsel %vm102_vm0, %v59_v9, -inf  ;;  %v107_v17 = vsel %vm102_vm0, %v76_v11, -inf  ;;  %p194_p9 = pnand %p193_p8, %p187_p5 }
  0x17   :  { %v68_v18 = vcombine.high %v66_v12, %v66_v12  ;;  %v85_v19 = vcombine.high %v83_v14, %v83_v14  ;;  %v105_v21 = vsel %vm102_vm0, %v66_v12, -inf  ;;  %v108_v22 = vmax.f32 %v103_v16, %v107_v17  ;;  %v126_v34 = vld [vmem:[#allocation2] sm:$0x3] }
  0x18   :  { %v104_v20 = vsel %vm102_vm0, %v67_v13, -inf  ;;  %v109_v23 = vsel %vm102_vm0, %v84_v15, -inf  ;;  %v111_v24 = vsel %vm102_vm0, %v83_v14, -inf }
  0x19   :  { %v106_v25 = vsel %vm102_vm0, %v68_v18, -inf  ;;  %v110_v26 = vmax.f32 %v104_v20, %v109_v23  ;;  %v112_v27 = vmax.f32 %v105_v21, %v111_v24  ;;  %v113_v28 = vsel %vm102_vm0, %v85_v19, -inf }
  0x1a   :  { %v114_v29 = vmax.f32 %v106_v25, %v113_v28 }
  0x1b   :  { %v115_v30 = vmax.f32 %v108_v22, %v110_v26 }
  0x1c   :  { %v116_v31 = vmax.f32 %v112_v27, %v114_v29 }
  0x1e   :  { %v117_v32 = vmax.f32 %v115_v30, %v116_v31 }
  0x20   :  { %118 = vmax.xlane.f32.xlu0 %v117_v32 }
  0xa9   :  { %v119_v35 = vpop.xlane.xlu0 %118 }
  0xaa   :  { %v127_v36 = vmax.f32 %v126_v34, %v119_v35 }
  0xac   :  { %129 = vst.msk [vmem:[#allocation2] sm:$0x3] %vm124_vm1, %v127_v36 }
  0xb3   :  { %v133_v37 = vld [vmem:[#allocation2] sm:$0x3] }
  0xb4   :  { %v134_v38 = vsel %vm124_vm1, %v133_v37, 0.0 }
  0xb5   :  { %v135_v39 = vrot.slane %v134_v38, 4 }
  0xb7   :  { %v136_v40 = vadd.f32 %v135_v39, %v134_v38 }
  0xb9   :  { %v137_v41 = vrot.slane %v136_v40, 2 }
  0xbb   :  { %v138_v42 = vadd.f32 %v137_v41, %v136_v40 }
  0xbd   :  { %v139_v43 = vrot.slane %v138_v42, 1 }
  0xbf   :  { %v140_v44 = vadd.f32 %v139_v43, %v138_v42 }
  0xc1   :  { %v142_v45 = vmul.f32 0.5, %v140_v44 }
  0xc3   :  { %144 = vst.msk [vmem:[#allocation6] sm:$0x1] %vm143_vm2, %v142_v45 }
  0xc4   :  { %197 = shalt.err (!%p194_p9)
}
  0xc5   :  { %154 = dma.vmem_to_hbm [thread:$0]  %s152_s11, 16, %s239_s1, [#allocation5]  }
  0xc6   :  { %208 = dma.done.wait [#allocation5], 16  }
  0xc7   :  { %209 = vsyncadd [#allocation5], 4294967280 }
  0xc8   :  { %158 = vsyncpa [#allocation4], 1 }
  0xc9   :  { %159 = vsyncpa [#allocation5], 1 }

</bundles_post_ra>
